<compile_context>
chip_gen: v6e
topology: v6e:2x2x1
jax: 0.10.0
libtpu: 0.0.40
codegen_flags: <defaults>
</compile_context>

<pallas_src>
import jax
import jax.numpy as jnp
from jax.experimental import pallas as pl
from jax.experimental.pallas import tpu as pltpu

_LANE = 128
_MAX_COLS = 8192
_SMALL_SINGLE_BLOCK_BYTES = 4 * 1024 * 1024


def _copy_kernel(x_ref, o_ref):
    # Identity forward; the (currently no-op) cast is fused into the copy so a
    # real dtype upcast would not need a second HBM pass.
    o_ref[...] = x_ref[...].astype(o_ref.dtype)


def _pick_cols(n):
    """Largest multiple of 128 (<= 8192) that divides n; 0 if none exists."""
    best = 0
    c = _LANE
    while c <= _MAX_COLS:
        if n % c == 0:
            best = c
        c += _LANE
    return best


def _hw_tuning():
    """(block_bytes, vmem_limit_bytes, min_grid_programs) per TPU generation."""
    kind = ""
    try:
        kind = jax.devices()[0].device_kind.lower()
    except Exception:  # pragma: no cover - defensive; keep conservative tuning
        pass
    if "v7" in kind:
        # 64 MiB physical VMEM, ~3.2 TB/s HBM: larger blocks amortize per-step
        # overhead; 8 MiB x (in+out) x 2 buffers = 32 MiB, raise scoped limit.
        return 8 * 1024 * 1024, 48 * 1024 * 1024, 4
    if "v6" in kind:
        # 4 MiB blocks -> 16 MiB total, well inside the 32 MiB default limit.
        return 4 * 1024 * 1024, None, 1
    # v5e (16 MiB default scoped VMEM) and unknown: stay at 2 MiB blocks.
    return 2 * 1024 * 1024, None, 1


def upcast_forward(x, out_dtype=None, *, materialize=False, _block_bytes=None):
    """Forward of `upcast`.

    Default call is a true identity (returns x, no kernel launch).  With
    `materialize=True` (or a differing `out_dtype`) a lane-dense Pallas TPU
    copy/cast kernel is run instead.
    """
    out_dtype = jnp.dtype(out_dtype) if out_dtype is not None else jnp.dtype(x.dtype)

    if not materialize and out_dtype == x.dtype:
        # Pure identity: skip the kernel entirely (unbounded win vs. copying).
        return x

    if x.size == 0:
        return x.astype(out_dtype)

    orig_shape = x.shape
    n = x.size
    in_item = jnp.dtype(x.dtype).itemsize
    out_item = out_dtype.itemsize
    budget_item = max(in_item, out_item)

    block_bytes, vmem_limit, min_programs = _hw_tuning()
    if _block_bytes is not None:
        block_bytes = _block_bytes

    cols = _pick_cols(n)
    if cols == 0:
        # n is not a multiple of 128: a single full-extent block is always a
        # legal block shape, so small ragged arrays are copied in one shot.
        if n * budget_item <= _SMALL_SINGLE_BLOCK_BYTES:
            x2d = x.reshape(1, n)
            out2d = pl.pallas_call(
                _copy_kernel,
                out_shape=jax.ShapeDtypeStruct((1, n), out_dtype),
            )(x2d)
            return out2d.reshape(orig_shape)
        # TODO(synk): in-kernel masked tail handling for large sizes that are
        # not a multiple of 128; forward is identity so this is semantically
        # equivalent and avoids the old pad+slice 3x-traffic path.
        return x.astype(out_dtype)

    rows = n // cols
    x2d = x.reshape(rows, cols)

    # Rows per block: ~block_bytes of the *wider* dtype, multiple of 32 so
    # packed-sublane dtypes (bf16/int8/fp8) tile cleanly.
    tile_rows = max(32, (block_bytes // (cols * budget_item)) // 32 * 32)
    if min_programs > 1 and rows >= min_programs * 32:
        # Ensure enough grid steps to shard the "parallel" axis across both
        # v7x TensorCores while keeping pipelining alive.
        per_prog = max(32, (pl.cdiv(rows, min_programs) // 32) * 32)
        tile_rows = min(tile_rows, per_prog)
    if tile_rows >= rows:
        tile_rows = rows  # full row extent is always a legal block shape
    grid = (pl.cdiv(rows, tile_rows),)

    out2d = pl.pallas_call(
        _copy_kernel,
        out_shape=jax.ShapeDtypeStruct((rows, cols), out_dtype),
        grid_spec=pltpu.PrefetchScalarGridSpec(
            num_scalar_prefetch=0,
            grid=grid,
            in_specs=[pl.BlockSpec((tile_rows, cols), lambda i: (i, 0))],
            out_specs=pl.BlockSpec((tile_rows, cols), lambda i: (i, 0)),
        ),
        compiler_params=pltpu.CompilerParams(
            dimension_semantics=("parallel",),
            vmem_limit_bytes=vmem_limit,
        ),
        cost_estimate=pl.CostEstimate(
            flops=0,
            transcendentals=0,
            bytes_accessed=n * (in_item + out_item),
        ),
    )(x2d)

    return out2d.reshape(orig_shape)


if __name__ == "__main__":
    key = jax.random.PRNGKey(0)

    # Small NCHW input consistent with a typical transform-test tensor.
    x = jax.random.normal(key, (2, 4, 16, 16), dtype=jnp.float32)

    # 1) Default path: true identity, no kernel launch.
    y_id = jax.block_until_ready(upcast_forward(x))
    assert y_id.shape == x.shape and y_id.dtype == x.dtype
    assert bool(jnp.all(y_id == x))

    # 2) Materialized path: run the Pallas copy kernel once.
    y = jax.block_until_ready(upcast_forward(x, materialize=True))
    assert y.shape == x.shape and y.dtype == x.dtype
    assert bool(jnp.all(y == x))

    # 3) Multi-step pipelined path: moderate shape, forced small block so the
    #    grid has several steps (deterministic regardless of TPU generation).
    x_big = jax.random.normal(key, (16, 4, 64, 128), dtype=jnp.float32)
    y_big = jax.block_until_ready(
        upcast_forward(x_big, materialize=True, _block_bytes=128 * 1024))
    assert y_big.shape == x_big.shape and y_big.dtype == x_big.dtype
    assert bool(jnp.all(y_big == x_big))

    # 4) Ragged size (not a multiple of 128): single full-extent block path.
    x_rag = jax.random.normal(key, (2, 3, 5, 7), dtype=jnp.float32)
    y_rag = jax.block_until_ready(upcast_forward(x_rag, materialize=True))
    assert y_rag.shape == x_rag.shape and y_rag.dtype == x_rag.dtype
    assert bool(jnp.all(y_rag == x_rag))

    print("KERNEL_OK")
</pallas_src>

<mosaic_0001>
module attributes {stable_mosaic.version = 11 : i64} {
  func.func @_copy_kernel(%arg0: i32, %arg1: memref<1x2048xf32, #tpu.memory_space<vmem>>, %arg2: memref<1x2048xf32, #tpu.memory_space<vmem>>) attributes {dimension_semantics = [#tpu.dimension_semantics<parallel>], iteration_bounds = array<i64: 1>, scalar_prefetch = 0 : i64, scratch_operands = 0 : i64, tpu.core_type = #tpu.core_type<tc>, window_params = [{transform_indices = @transform_0, window_bounds = array<i64: 1, 2048>}, {transform_indices = @transform_1, window_bounds = array<i64: 1, 2048>}]} {
    %c0 = arith.constant 0 : index
    %c0_0 = arith.constant 0 : index
    %0 = vector.load %arg1[%c0, %c0_0] : memref<1x2048xf32, #tpu.memory_space<vmem>>, vector<1x2048xf32>
    %c0_1 = arith.constant 0 : index
    %c0_2 = arith.constant 0 : index
    %1 = vector.load %arg2[%c0_1, %c0_2] : memref<1x2048xf32, #tpu.memory_space<vmem>>, vector<1x2048xf32>
    tpu.vector_store %arg2[%c0_1, %c0_2], %0 {strides = array<i32>} : memref<1x2048xf32, #tpu.memory_space<vmem>>, vector<1x2048xf32>,
    return
  }
  func.func @transform_0(%arg0: i32) -> (i32, i32) {
    %c0_i32 = arith.constant 0 : i32
    %c0_i32_0 = arith.constant 0 : i32
    return %arg0, %c0_i32 : i32, i32
  }
  func.func @transform_1(%arg0: i32) -> (i32, i32) {
    %c0_i32 = arith.constant 0 : i32
    %c0_i32_0 = arith.constant 0 : i32
    return %arg0, %c0_i32 : i32, i32
  }
}

</mosaic_0001>

<bundles_post_ra>
// kernel: tpu_custom_call.1
= control target key start
LH: loop header
LB: loop body
LE: loop exit
PB: predicated region body
PF: predicated region fallthrough
CT: control target
= control target key end

     0   :  { %6 = vsyncpa [#allocation3], 0  ;;  %s104_s0 = inlined_call_operand.hbm [shape: f32[1,2048], index: 0, kind: input, shape index: {}]   ;;  %s105_s1 = inlined_call_operand.hbm [shape: f32[1,2048], index: 1, kind: output, shape index: {}]  }
   0x1   :  { %7 = vsyncpa [#allocation4], 0  ;;  %s86_s6 = smov [#allocation2]  }
   0x2   :  { %s14_s7 = sshll.u32 %s86_s6, 4  ;;  %s15_s7 = int_to_ptr.vmem [resolvable:$true] %s14_s7 }
   0x3   :  { %s50_s8 = scalar_lea.vmem %s15_s7, 256  ;;  %p55_p1 = scmp.lt.s32.totalorder %s15_s7, %s15_s7 }
   0x4   :  { %p51_p0 = scmp.ne.s32.totalorder %s15_s7, %s50_s8  ;;  %p56_p2 = scmp.lt.s32.totalorder %s50_s8, %s50_s8 }
   0x6   :  { %p57_p3 = por %p56_p2, %p55_p1 }
   0x8   :  { %p58_p4 = pnand %p57_p3, %p51_p0 }
   0xa   :  { %61 = shalt.err (!%p58_p4)
}
   0xb   :  { %17 = dma.hbm_to_vmem [thread:$0]  %s104_s0, 256, %s15_s7, [#allocation3]  }
   0xc   :  { %82 = dma.done.wait [#allocation3], 256  }
   0xd   :  { %83 = vsyncadd [#allocation3], 4294967040  ;;  %s87_s11 = smov [#allocation5]   ;;  %v21_v0 = vld [vmem:[#allocation2] sm:$0xff]  ;;  %v22_v1 = vld [vmem:[#allocation2 + $0x8] sm:$0xff] }
   0xe   :  { %s31_s12 = sshll.u32 %s87_s11, 4  ;;  %23 = vst [vmem:[#allocation5] sm:$0xff] %v21_v0  ;;  %24 = vst [vmem:[#allocation5 + $0x8] sm:$0xff] %v22_v1  ;;  %s32_s12 = int_to_ptr.vmem [resolvable:$true] %s31_s12 }
   0xf   :  { %s62_s13 = scalar_lea.vmem %s32_s12, 256  ;;  %p67_p6 = scmp.lt.s32.totalorder %s32_s12, %s32_s12 }
  0x10   :  { %p63_p5 = scmp.ne.s32.totalorder %s32_s12, %s62_s13  ;;  %p68_p7 = scmp.lt.s32.totalorder %s62_s13, %s62_s13 }
  0x12   :  { %p69_p8 = por %p68_p7, %p67_p6 }
  0x14   :  { %p70_p9 = pnand %p69_p8, %p63_p5 }
  0x16   :  { %73 = shalt.err (!%p70_p9)
}
  0x17   :  { %34 = dma.vmem_to_hbm [thread:$0]  %s32_s12, 256, %s105_s1, [#allocation4]  }
  0x18   :  { %84 = dma.done.wait [#allocation4], 256  }
  0x19   :  { %85 = vsyncadd [#allocation4], 4294967040 }
  0x1a   :  { %38 = vsyncpa [#allocation3], 1 }
  0x1b   :  { %39 = vsyncpa [#allocation4], 1 }

</bundles_post_ra>
